<compile_context>
chip_gen: v6e
topology: v6e:2x2x1
jax: 0.10.0
libtpu: 0.0.40
codegen_flags: <defaults>
</compile_context>

<pallas_src>
import jax
import jax.numpy as jnp
from jax.experimental import pallas as pl
from jax.experimental.pallas import tpu as pltpu


def _round_up(x, m):
    return ((x + m - 1) // m) * m


def _combined_mlp_kernel(x_ref, w1_ref, b12_ref, w2_ref, w3_ref, b3_ref, out_ref):
    # biases stacked: row 0 = b1, row 1 = b2 (kept in f32)
    b12 = b12_ref[...]

    # Linear1 on the (virtually) concatenated, seq-mean-folded input:
    # single lane-dense MXU contraction, f32 accumulation.
    h1 = jnp.dot(x_ref[...], w1_ref[...],
                 preferred_element_type=jnp.float32) + b12[0:1, :]
    h1 = jnp.maximum(h1, 0.0)                                   # (bt, H_PAD) f32

    # Linear2 + ReLU
    h2 = jnp.dot(h1.astype(w2_ref.dtype), w2_ref[...],
                 preferred_element_type=jnp.float32) + b12[1:2, :]
    h2 = jnp.maximum(h2, 0.0)                                   # (bt, H_PAD) f32

    # Linear3 (no activation); output is lane-dense (OUT padded to 128)
    out_ref[...] = jnp.dot(h2.astype(w3_ref.dtype), w3_ref[...],
                           preferred_element_type=jnp.float32) + b3_ref[...]


def combined_mlp(image_features, ego_features, params, *, compute_dtype=jnp.float32):
    """image_features: (B, IMG); ego_features: (B, S, EGO) or (B, EGO).

    compute_dtype: jnp.float32 (default) or jnp.bfloat16 for the v6e/v7x MXU.
    Accumulation is always f32; biases and epilogue math stay f32.
    """
    if ego_features.ndim == 2:
        ego_features = ego_features[:, None, :]

    B, img_dim = image_features.shape
    _, S, ego_dim = ego_features.shape
    w1i, w1e, b1, w2, b2, w3, b3 = params
    H = w1i.shape[1]
    OUT = w3.shape[1]

    IMG_PAD = _round_up(img_dim, 128)
    EGOF_PAD = _round_up(S * ego_dim, 128)
    IN_PAD = IMG_PAD + EGOF_PAD
    H_PAD = _round_up(H, 128)
    OUT_PAD = _round_up(OUT, 128)

    def pad2(a, rows, cols):
        return jnp.pad(a, ((0, rows - a.shape[0]), (0, cols - a.shape[1])))

    # --- fold the seq-mean into W1's ego block:
    #     mean_s(ego) @ W1e == ego_flat @ tile(W1e / S, (S, 1))
    w1e_exp = jnp.tile(w1e / S, (S, 1))                      # (S*EGO, H)

    # --- fuse the concat: stack W1 row blocks (zero-padded to lane-dense
    #     column groups) into one (IN_PAD, H_PAD) weight.
    w1_p = jnp.concatenate(
        [pad2(w1i, IMG_PAD, H_PAD), pad2(w1e_exp, EGOF_PAD, H_PAD)], axis=0
    ).astype(compute_dtype)                                   # (IN_PAD, H_PAD)
    w2_p = pad2(w2, H_PAD, H_PAD).astype(compute_dtype)
    w3_p = pad2(w3, H_PAD, OUT_PAD).astype(compute_dtype)
    b12_p = jnp.concatenate([pad2(b1, 1, H_PAD), pad2(b2, 1, H_PAD)], axis=0)  # (2, H_PAD) f32
    b3_p = pad2(b3, 1, OUT_PAD)                                                # (1, OUT_PAD) f32

    # --- pack image + flattened ego into one lane-dense input slab (wrapper-side
    #     layout plumbing, done once); extra columns are zeros.
    ego_flat = ego_features.reshape(B, S * ego_dim)
    x = jnp.concatenate(
        [pad2(image_features, B, IMG_PAD), pad2(ego_flat, B, EGOF_PAD)], axis=1
    ).astype(compute_dtype)                                   # (B, IN_PAD)

    # --- batch tiling: weights resident, rows streamed; parallel grid for megacore.
    #     Batch is zero-padded to the tile so any B is handled exactly.
    bt = 256 if B >= 256 else max(8, _round_up(B, 8))
    B_pad = _round_up(B, bt)
    if B_pad != B:
        x = jnp.pad(x, ((0, B_pad - B), (0, 0)))
    grid = (B_pad // bt,)

    row_spec = lambda shape: pl.BlockSpec(shape, lambda i: (i, 0))
    pin_spec = lambda shape: pl.BlockSpec(shape, lambda i: (0, 0))

    out_padded = pl.pallas_call(
        _combined_mlp_kernel,
        out_shape=jax.ShapeDtypeStruct((B_pad, OUT_PAD), jnp.float32),
        grid=grid,
        in_specs=[
            row_spec((bt, IN_PAD)),
            pin_spec((IN_PAD, H_PAD)),
            pin_spec((2, H_PAD)),
            pin_spec((H_PAD, H_PAD)),
            pin_spec((H_PAD, OUT_PAD)),
            pin_spec((1, OUT_PAD)),
        ],
        out_specs=row_spec((bt, OUT_PAD)),
        compiler_params=pltpu.CompilerParams(dimension_semantics=("parallel",)),
    )(x, w1_p, b12_p, w2_p, w3_p, b3_p)

    # drop batch/lane padding outside the kernel (fold into the consumer in practice)
    return out_padded[:B, :OUT]


def init_params(key, image_feature_dim, ego_feature_dim, hidden_dim, output_dim):
    """Deterministic synthetic init (uniform, PyTorch-Linear-like scaling)."""
    in_dim = image_feature_dim + ego_feature_dim
    k = jax.random.split(key, 6)

    def lin(kw, kb, fan_in, fan_out):
        bound = 1.0 / jnp.sqrt(fan_in)
        w = jax.random.uniform(kw, (fan_in, fan_out), jnp.float32, -bound, bound)
        b = jax.random.uniform(kb, (1, fan_out), jnp.float32, -bound, bound)
        return w, b

    w1, b1 = lin(k[0], k[1], in_dim, hidden_dim)
    w2, b2 = lin(k[2], k[3], hidden_dim, hidden_dim)
    w3, b3 = lin(k[4], k[5], hidden_dim, output_dim)
    # split W1 into image-rows / ego-rows blocks (fuses the concat away)
    w1i = w1[:image_feature_dim]
    w1e = w1[image_feature_dim:]
    return (w1i, w1e, b1, w2, b2, w3, b3)


def reference(image_features, ego_features, params):
    """Pure-JAX reference matching the PyTorch forward."""
    if ego_features.ndim == 3:
        ego_features = ego_features.mean(axis=1)
    w1i, w1e, b1, w2, b2, w3, b3 = params
    w1 = jnp.concatenate([w1i, w1e], axis=0)
    x = jnp.concatenate([image_features, ego_features], axis=1)
    h1 = jnp.maximum(x @ w1 + b1, 0.0)
    h2 = jnp.maximum(h1 @ w2 + b2, 0.0)
    return h2 @ w3 + b3


if __name__ == "__main__":
    IMG_DIM, EGO_DIM, HIDDEN, OUT = 32, 16, 32, 8
    S = 8

    key = jax.random.PRNGKey(0)
    k_img, k_ego, k_params, k_img2, k_ego2 = jax.random.split(key, 5)
    params = init_params(k_params, IMG_DIM, EGO_DIM, HIDDEN, OUT)

    # --- small-batch path (single block, batch padded to 8 rows) ---
    B = 2
    image_features = jax.random.normal(k_img, (B, IMG_DIM), jnp.float32)
    ego_features = jax.random.normal(k_ego, (B, S, EGO_DIM), jnp.float32)

    out = combined_mlp(image_features, ego_features, params)
    out = jax.block_until_ready(out)
    ref = reference(image_features, ego_features, params)
    assert out.shape == (B, OUT)
    assert jnp.allclose(out, ref, atol=1e-4, rtol=1e-4), "mismatch vs reference (B=2, 3D ego)"

    # --- 2D ego path (no seq-mean) ---
    ego_2d = jax.random.normal(k_ego, (B, EGO_DIM), jnp.float32)
    out_2d = jax.block_until_ready(combined_mlp(image_features, ego_2d, params))
    ref_2d = reference(image_features, ego_2d, params)
    assert jnp.allclose(out_2d, ref_2d, atol=1e-4, rtol=1e-4), "mismatch vs reference (2D ego)"

    # --- batched path (grid over B, weights resident, parallel semantics) ---
    BB = 512
    image_features_b = jax.random.normal(k_img2, (BB, IMG_DIM), jnp.float32)
    ego_features_b = jax.random.normal(k_ego2, (BB, S, EGO_DIM), jnp.float32)

    out_b = combined_mlp(image_features_b, ego_features_b, params)
    out_b = jax.block_until_ready(out_b)
    ref_b = reference(image_features_b, ego_features_b, params)
    assert out_b.shape == (BB, OUT)
    assert jnp.allclose(out_b, ref_b, atol=1e-4, rtol=1e-4), "mismatch vs reference (B=512)"

    print("KERNEL_OK")
</pallas_src>

<mosaic_0001>
module attributes {stable_mosaic.version = 11 : i64} {
  func.func @_combined_mlp_kernel(%arg0: i32, %arg1: memref<8x256xf32, #tpu.memory_space<vmem>>, %arg2: memref<256x128xf32, #tpu.memory_space<vmem>>, %arg3: memref<2x128xf32, #tpu.memory_space<vmem>>, %arg4: memref<128x128xf32, #tpu.memory_space<vmem>>, %arg5: memref<128x128xf32, #tpu.memory_space<vmem>>, %arg6: memref<1x128xf32, #tpu.memory_space<vmem>>, %arg7: memref<8x128xf32, #tpu.memory_space<vmem>>) attributes {dimension_semantics = [#tpu.dimension_semantics<parallel>], iteration_bounds = array<i64: 1>, scalar_prefetch = 0 : i64, scratch_operands = 0 : i64, tpu.core_type = #tpu.core_type<tc>, window_params = [{transform_indices = @transform_0, window_bounds = array<i64: 8, 256>}, {pipeline_mode = #tpu.pipeline_mode<synchronous>, transform_indices = @transform_1, window_bounds = array<i64: 256, 128>}, {pipeline_mode = #tpu.pipeline_mode<synchronous>, transform_indices = @transform_2, window_bounds = array<i64: 2, 128>}, {pipeline_mode = #tpu.pipeline_mode<synchronous>, transform_indices = @transform_3, window_bounds = array<i64: 128, 128>}, {pipeline_mode = #tpu.pipeline_mode<synchronous>, transform_indices = @transform_4, window_bounds = array<i64: 128, 128>}, {pipeline_mode = #tpu.pipeline_mode<synchronous>, transform_indices = @transform_5, window_bounds = array<i64: 1, 128>}, {transform_indices = @transform_6, window_bounds = array<i64: 8, 128>}]} {
    %c0 = arith.constant 0 : index
    %c0_0 = arith.constant 0 : index
    %0 = vector.load %arg3[%c0, %c0_0] : memref<2x128xf32, #tpu.memory_space<vmem>>, vector<2x128xf32>
    %c0_1 = arith.constant 0 : index
    %c0_2 = arith.constant 0 : index
    %1 = vector.load %arg1[%c0_1, %c0_2] : memref<8x256xf32, #tpu.memory_space<vmem>>, vector<8x256xf32>
    %c0_3 = arith.constant 0 : index
    %c0_4 = arith.constant 0 : index
    %2 = vector.load %arg2[%c0_3, %c0_4] : memref<256x128xf32, #tpu.memory_space<vmem>>, vector<256x128xf32>
    %cst = arith.constant dense<0.000000e+00> : vector<8x128xf32>
    %3 = tpu.matmul %1, %2, %cst {dimension_numbers = #tpu.dot_dimension_numbers<[1], [0], [0], [1], [0, 0, 1, 1], [], []>} : vector<8x256xf32>, vector<256x128xf32>, vector<8x128xf32> -> vector<8x128xf32>
    %4 = vector.extract_strided_slice %0 {offsets = [0, 0], sizes = [1, 128], strides = [1, 1]} : vector<2x128xf32> to vector<1x128xf32>
    %5 = vector.broadcast %4 : vector<1x128xf32> to vector<8x128xf32>
    %6 = arith.addf %3, %5 : vector<8x128xf32>
    %cst_5 = arith.constant 0.000000e+00 : f32
    %7 = vector.broadcast %cst_5 : f32 to vector<8x128xf32>
    %8 = arith.maximumf %6, %7 : vector<8x128xf32>
    %c0_6 = arith.constant 0 : index
    %c0_7 = arith.constant 0 : index
    %9 = vector.load %arg4[%c0_6, %c0_7] : memref<128x128xf32, #tpu.memory_space<vmem>>, vector<128x128xf32>
    %cst_8 = arith.constant dense<0.000000e+00> : vector<8x128xf32>
    %10 = tpu.matmul %8, %9, %cst_8 {dimension_numbers = #tpu.dot_dimension_numbers<[1], [0], [0], [1], [0, 0, 1, 1], [], []>} : vector<8x128xf32>, vector<128x128xf32>, vector<8x128xf32> -> vector<8x128xf32>
    %11 = vector.extract_strided_slice %0 {offsets = [1, 0], sizes = [1, 128], strides = [1, 1]} : vector<2x128xf32> to vector<1x128xf32>
    %12 = vector.broadcast %11 : vector<1x128xf32> to vector<8x128xf32>
    %13 = arith.addf %10, %12 : vector<8x128xf32>
    %cst_9 = arith.constant 0.000000e+00 : f32
    %14 = vector.broadcast %cst_9 : f32 to vector<8x128xf32>
    %15 = arith.maximumf %13, %14 : vector<8x128xf32>
    %c0_10 = arith.constant 0 : index
    %c0_11 = arith.constant 0 : index
    %16 = vector.load %arg5[%c0_10, %c0_11] : memref<128x128xf32, #tpu.memory_space<vmem>>, vector<128x128xf32>
    %cst_12 = arith.constant dense<0.000000e+00> : vector<8x128xf32>
    %17 = tpu.matmul %15, %16, %cst_12 {dimension_numbers = #tpu.dot_dimension_numbers<[1], [0], [0], [1], [0, 0, 1, 1], [], []>} : vector<8x128xf32>, vector<128x128xf32>, vector<8x128xf32> -> vector<8x128xf32>
    %c0_13 = arith.constant 0 : index
    %c0_14 = arith.constant 0 : index
    %18 = vector.load %arg6[%c0_13, %c0_14] : memref<1x128xf32, #tpu.memory_space<vmem>>, vector<1x128xf32>
    %19 = vector.broadcast %18 : vector<1x128xf32> to vector<8x128xf32>
    %20 = arith.addf %17, %19 : vector<8x128xf32>
    %c0_15 = arith.constant 0 : index
    %c0_16 = arith.constant 0 : index
    %21 = vector.load %arg7[%c0_15, %c0_16] : memref<8x128xf32, #tpu.memory_space<vmem>>, vector<8x128xf32>
    tpu.vector_store %arg7[%c0_15, %c0_16], %20 {strides = array<i32>} : memref<8x128xf32, #tpu.memory_space<vmem>>, vector<8x128xf32>,
    return
  }
  func.func @transform_0(%arg0: i32) -> (i32, i32) {
    %c0_i32 = arith.constant 0 : i32
    %c0_i32_0 = arith.constant 0 : i32
    return %arg0, %c0_i32 : i32, i32
  }
  func.func @transform_1(%arg0: i32) -> (i32, i32) {
    %c0_i32 = arith.constant 0 : i32
    %c0_i32_0 = arith.constant 0 : i32
    %c0_i32_1 = arith.constant 0 : i32
    return %c0_i32, %c0_i32_0 : i32, i32
  }
  func.func @transform_2(%arg0: i32) -> (i32, i32) {
    %c0_i32 = arith.constant 0 : i32
    %c0_i32_0 = arith.constant 0 : i32
    %c0_i32_1 = arith.constant 0 : i32
    return %c0_i32, %c0_i32_0 : i32, i32
  }
  func.func @transform_3(%arg0: i32) -> (i32, i32) {
    %c0_i32 = arith.constant 0 : i32
    %c0_i32_0 = arith.constant 0 : i32
    %c0_i32_1 = arith.constant 0 : i32
    return %c0_i32, %c0_i32_0 : i32, i32
  }
  func.func @transform_4(%arg0: i32) -> (i32, i32) {
    %c0_i32 = arith.constant 0 : i32
    %c0_i32_0 = arith.constant 0 : i32
    %c0_i32_1 = arith.constant 0 : i32
    return %c0_i32, %c0_i32_0 : i32, i32
  }
  func.func @transform_5(%arg0: i32) -> (i32, i32) {
    %c0_i32 = arith.constant 0 : i32
    %c0_i32_0 = arith.constant 0 : i32
    %c0_i32_1 = arith.constant 0 : i32
    return %c0_i32, %c0_i32_0 : i32, i32
  }
  func.func @transform_6(%arg0: i32) -> (i32, i32) {
    %c0_i32 = arith.constant 0 : i32
    %c0_i32_0 = arith.constant 0 : i32
    return %arg0, %c0_i32 : i32, i32
  }
}

</mosaic_0001>

<bundles_post_ra>
// kernel: tpu_custom_call.1
= control target key start
LH: loop header
LB: loop body
LE: loop exit
PB: predicated region body
PF: predicated region fallthrough
CT: control target
= control target key end

     0   :  { %11 = vsyncpa [#allocation3], 0  ;;  %s754_s0 = inlined_call_operand.hbm [shape: f32[8,256], index: 0, kind: input, shape index: {}]   ;;  %s755_s1 = inlined_call_operand.hbm [shape: f32[256,128], index: 1, kind: input, shape index: {}]   ;;  %s756_s2 = inlined_call_operand.vmem [shape: f32[2,128], index: 2, kind: input, shape index: {}]   ;;  %s757_s3 = inlined_call_operand.hbm [shape: f32[128,128], index: 3, kind: input, shape index: {}]   ;;  %s758_s4 = inlined_call_operand.hbm [shape: f32[128,128], index: 4, kind: input, shape index: {}]   ;;  %s759_s5 = inlined_call_operand.vmem [shape: f32[1,128], index: 5, kind: input, shape index: {}]   ;;  %s760_s6 = inlined_call_operand.hbm [shape: f32[8,128], index: 6, kind: output, shape index: {}]  }
   0x1   :  { %12 = vsyncpa [#allocation6], 0 }
   0x2   :  { %13 = vsyncpa [#allocation9], 0 }
   0x3   :  { %14 = vsyncpa [#allocation4], 0  ;;  %s646_s21 = smov [#allocation5]  }
   0x4   :  { %s30_s22 = sshll.u32 %s646_s21, 4  ;;  %s31_s22 = int_to_ptr.vmem [resolvable:$true] %s30_s22 }
   0x5   :  { %s546_s23 = scalar_lea.vmem %s31_s22, 4096  ;;  %p551_p1 = scmp.lt.s32.totalorder %s31_s22, %s31_s22 }
   0x6   :  { %p547_p0 = scmp.ne.s32.totalorder %s31_s22, %s546_s23  ;;  %p552_p2 = scmp.lt.s32.totalorder %s546_s23, %s546_s23 }
   0x8   :  { %p553_p3 = por %p552_p2, %p551_p1 }
   0xa   :  { %p554_p4 = pnand %p553_p3, %p547_p0 }
   0xc   :  { %557 = shalt.err (!%p554_p4)
}
   0xd   :  { %s647_s24 = smov 128   ;;  %s648_s25 = smov 8  }
   0xe   :  { %36 = dma.hbm_to_vmem [thread:$0]  %s755_s1, 4096, %s31_s22, [#allocation6], %s647_s24, %s647_s24, %s648_s25  }
   0xf   :  { %s649_s28 = smov [#allocation2]   ;;  %s650_s30 = smov [#allocation7]  }
  0x10   :  { %s21_s29 = sshll.u32 %s649_s28, 4  ;;  %s44_s7 = sshll.u32 %s650_s30, 4  ;;  %s22_s29 = int_to_ptr.vmem [resolvable:$true] %s21_s29  ;;  %s45_s7 = int_to_ptr.vmem [resolvable:$true] %s44_s7 }
  0x11   :  { %s566_s8 = scalar_lea.vmem %s22_s29, 256  ;;  %p571_p6 = scmp.lt.s32.totalorder %s22_s29, %s22_s29 }
  0x12   :  { %p567_p5 = scmp.ne.s32.totalorder %s22_s29, %s566_s8  ;;  %p572_p7 = scmp.lt.s32.totalorder %s566_s8, %s566_s8 }
  0x14   :  { %p573_p8 = por %p572_p7, %p571_p6 }
  0x16   :  { %p574_p9 = pnand %p573_p8, %p567_p5 }
  0x18   :  { %577 = shalt.err (!%p574_p9)
}
  0x19   :  { %24 = dma.hbm_to_vmem [thread:$0]  %s754_s0, 256, %s22_s29, [#allocation3]  }
  0x1a   :  { %s586_s11 = scalar_lea.vmem %s45_s7, 2048  ;;  %p591_p11 = scmp.lt.s32.totalorder %s45_s7, %s45_s7 }
  0x1b   :  { %p587_p10 = scmp.ne.s32.totalorder %s45_s7, %s586_s11  ;;  %p592_p12 = scmp.lt.s32.totalorder %s586_s11, %s586_s11 }
  0x1d   :  { %p593_p13 = por %p592_p12, %p591_p11 }
  0x1f   :  { %p594_p0 = pnand %p593_p13, %p587_p10 }
  0x21   :  { %597 = shalt.err (!%p594_p0)
}
  0x22   :  { %50 = dma.hbm_to_vmem [thread:$0]  %s757_s3, 2048, %s45_s7, [#allocation6], %s647_s24, %s647_s24, %s648_s25  }
  0x23   :  { %s651_s13 = smov [#allocation8]  }
  0x24   :  { %s56_s14 = sshll.u32 %s651_s13, 4  ;;  %s57_s14 = int_to_ptr.vmem [resolvable:$true] %s56_s14 }
  0x25   :  { %s606_s15 = scalar_lea.vmem %s57_s14, 2048  ;;  %p611_p2 = scmp.lt.s32.totalorder %s57_s14, %s57_s14 }
  0x26   :  { %p607_p1 = scmp.ne.s32.totalorder %s57_s14, %s606_s15  ;;  %p612_p3 = scmp.lt.s32.totalorder %s606_s15, %s606_s15 }
  0x28   :  { %p613_p4 = por %p612_p3, %p611_p2 }
  0x2a   :  { %p614_p5 = pnand %p613_p4, %p607_p1 }
  0x2c   :  { %617 = shalt.err (!%p614_p5)
}
  0x2d   :  { %62 = dma.hbm_to_vmem [thread:$0]  %s758_s4, 2048, %s57_s14, [#allocation9], %s647_s24, %s647_s24, %s648_s25  }
  0x2e   :  { %638 = dma.done.wait [#allocation3], 256  }
  0x2f   :  { %639 = vsyncadd [#allocation3], 4294967040 }
  0x30   :  { %640 = dma.done.wait [#allocation6], 6144  }
  0x31   :  { %641 = vsyncadd [#allocation6], 4294961152 }
  0x32   :  { %642 = dma.done.wait [#allocation9], 2048  }
  0x33   :  { %643 = vsyncadd [#allocation9], 4294965248  ;;  %v652_v0 = vmov 0.0   ;;  %v111_v1 = vld [vmem:[#allocation5 + $0xf8] sm:$0xff]  ;;  %v110_v3 = vld [vmem:[#allocation5 + $0xf0] sm:$0xff]  ;;  %v112_v48 = vlaneseq  ;;  %vm653_vm0 = vmmov 0  }
  0x34   :  { %459 = vmatprep.subr.mxu1 %v652_v0  ;;  %v95_v2 = vld [vmem:[#allocation5 + $0x78] sm:$0xff]  ;;  %390 = vmatprep.subr.mxu0 %v111_v1  ;;  %v94_v4 = vld [vmem:[#allocation5 + $0x70] sm:$0xff]  ;;  %v109_v5 = vld [vmem:[#allocation5 + $0xe8] sm:$0xff]  ;;  %s654_s18 = smov [#allocation10]  }
  0x35   :  { %391 = vmatpush3.msra.mxu0 %v95_v2  ;;  %v93_v6 = vld [vmem:[#allocation5 + $0x68] sm:$0xff]  ;;  %v108_v7 = vld [vmem:[#allocation5 + $0xe0] sm:$0xff]  ;;  %v107_v9 = vld [vmem:[#allocation5 + $0xd8] sm:$0xff]  ;;  %v113_v51 = vshrl.u32 %v112_v48, 7  ;;  %491 = vmatprep.mubr.msk.f32.mxu1 %vm653_vm0, %v652_v0  ;;  %s378_s19 = sshll.u32 %s654_s18, 4  ;;  %s379_s19 = int_to_ptr.vmem [resolvable:$true] %s378_s19 }
  0x36   :  { %392 = vmatprep.subr.mxu0 %v110_v3  ;;  %v92_v8 = vld [vmem:[#allocation5 + $0x60] sm:$0xff]  ;;  %v91_v10 = vld [vmem:[#allocation5 + $0x58] sm:$0xff]  ;;  %v106_v11 = vld [vmem:[#allocation5 + $0xd0] sm:$0xff]  ;;  %s618_s20 = scalar_lea.vmem %s379_s19, 128  ;;  %p623_p7 = scmp.lt.s32.totalorder %s379_s19, %s379_s19 }
  0x37   :  { %393 = vmatpush3.msra.mxu0 %v94_v4  ;;  %v90_v12 = vld [vmem:[#allocation5 + $0x50] sm:$0xff]  ;;  %v105_v13 = vld [vmem:[#allocation5 + $0xc8] sm:$0xff]  ;;  %v79_v14 = vld [vmem:[#allocation2 + $0x8] sm:$0xff]  ;;  %v205_v55 = vsub.s32 1, %v113_v51  ;;  %p619_p6 = scmp.ne.s32.totalorder %s379_s19, %s618_s20  ;;  %p624_p8 = scmp.lt.s32.totalorder %s618_s20, %s618_s20 }
  0x38   :  { %394 = vmatprep.subr.mxu0 %v109_v5  ;;  %v89_v15 = vld [vmem:[#allocation5 + $0x48] sm:$0xff]  ;;  %180 = vmatprep.mubr.f32.mxu0 %v79_v14  ;;  %v202_v16 = vld [vmem:[#allocation7 + $0x78] sm:$0xff]  ;;  %v201_v17 = vld [vmem:[#allocation7 + $0x70] sm:$0xff] }
  0x39   :  { %395 = vmatpush3.msra.mxu0 %v93_v6  ;;  %v104_v18 = vld [vmem:[#allocation5 + $0xc0] sm:$0xff]  ;;  %460 = vmatpush3.msra.mxu1 %v202_v16  ;;  %v200_v20 = vld [vmem:[#allocation7 + $0x68] sm:$0xff]  ;;  %v103_v21 = vld [vmem:[#allocation5 + $0xb8] sm:$0xff]  ;;  %v114_v6 = vsub.s32 0, %v113_v51  ;;  %p625_p9 = por %p624_p8, %p623_p7 }
  0x3a   :  { %396 = vmatprep.subr.mxu0 %v108_v7  ;;  %v88_v19 = vld [vmem:[#allocation5 + $0x40] sm:$0xff]  ;;  %461 = vmatprep.subr.mxu1 %v652_v0  ;;  %v87_v22 = vld [vmem:[#allocation5 + $0x38] sm:$0xff]  ;;  %v102_v24 = vld [vmem:[#allocation5 + $0xb0] sm:$0xff] }
  0x3b   :  { %397 = vmatpush3.msra.mxu0 %v92_v8  ;;  %462 = vmatpush3.msra.mxu1 %v201_v17  ;;  %v199_v23 = vld [vmem:[#allocation7 + $0x60] sm:$0xff]  ;;  %v86_v25 = vld [vmem:[#allocation5 + $0x30] sm:$0xff]  ;;  %v198_v26 = vld [vmem:[#allocation7 + $0x58] sm:$0xff]  ;;  %p626_p10 = pnand %p625_p9, %p619_p6 }
  0x3c   :  { %398 = vmatprep.subr.mxu0 %v107_v9  ;;  %463 = vmatprep.subr.mxu1 %v652_v0  ;;  %v101_v27 = vld [vmem:[#allocation5 + $0xa8] sm:$0xff]  ;;  %v197_v29 = vld [vmem:[#allocation7 + $0x50] sm:$0xff]  ;;  %v100_v30 = vld [vmem:[#allocation5 + $0xa0] sm:$0xff] }
  0x3d   :  { %399 = vmatpush3.msra.mxu0 %v91_v10  ;;  %464 = vmatpush3.msra.mxu1 %v200_v20  ;;  %v85_v28 = vld [vmem:[#allocation5 + $0x28] sm:$0xff]  ;;  %v84_v31 = vld [vmem:[#allocation5 + $0x20] sm:$0xff]  ;;  %v99_v33 = vld [vmem:[#allocation5 + $0x98] sm:$0xff] }
  0x3e   :  { %400 = vmatprep.subr.mxu0 %v106_v11  ;;  %465 = vmatprep.subr.mxu1 %v652_v0  ;;  %v196_v32 = vld [vmem:[#allocation7 + $0x48] sm:$0xff]  ;;  %v83_v34 = vld [vmem:[#allocation5 + $0x18] sm:$0xff]  ;;  %v195_v35 = vld [vmem:[#allocation7 + $0x40] sm:$0xff] }
  0x3f   :  { %401 = vmatpush3.msra.mxu0 %v90_v12  ;;  %466 = vmatpush3.msra.mxu1 %v199_v23  ;;  %v98_v36 = vld [vmem:[#allocation5 + $0x90] sm:$0xff]  ;;  %v194_v38 = vld [vmem:[#allocation7 + $0x38] sm:$0xff]  ;;  %v97_v39 = vld [vmem:[#allocation5 + $0x88] sm:$0xff] }
  0x40   :  { %402 = vmatprep.subr.mxu0 %v105_v13  ;;  %467 = vmatprep.subr.mxu1 %v652_v0  ;;  %v82_v37 = vld [vmem:[#allocation5 + $0x10] sm:$0xff]  ;;  %v81_v40 = vld [vmem:[#allocation5 + $0x8] sm:$0xff]  ;;  %v96_v42 = vld [vmem:[#allocation5 + $0x80] sm:$0xff] }
  0x41   :  { %403 = vmatpush3.msra.mxu0 %v89_v15  ;;  %468 = vmatpush3.msra.mxu1 %v198_v26  ;;  %v193_v41 = vld [vmem:[#allocation7 + $0x30] sm:$0xff]  ;;  %v80_v43 = vld [vmem:[#allocation5] sm:$0xff]  ;;  %v192_v44 = vld [vmem:[#allocation7 + $0x28] sm:$0xff] }
  0x42   :  { %404 = vmatprep.subr.mxu0 %v104_v18  ;;  %469 = vmatprep.subr.mxu1 %v652_v0  ;;  %v78_v45 = vld [vmem:[#allocation2] sm:$0xff]  ;;  %v191_v46 = vld [vmem:[#allocation7 + $0x20] sm:$0xff]  ;;  %v190_v47 = vld [vmem:[#allocation7 + $0x18] sm:$0xff] }
  0x43   :  { %405 = vmatpush3.msra.mxu0 %v88_v19  ;;  %470 = vmatpush3.msra.mxu1 %v197_v29  ;;  %v189_v49 = vld [vmem:[#allocation7 + $0x10] sm:$0xff]  ;;  %v188_v50 = vld [vmem:[#allocation7 + $0x8] sm:$0xff]  ;;  %v187_v52 = vld [vmem:[#allocation7] sm:$0xff] }
  0x44   :  { %406 = vmatprep.subr.mxu0 %v103_v21  ;;  %471 = vmatprep.subr.mxu1 %v652_v0  ;;  %v293_v53 = vld [vmem:[#allocation8 + $0x78] sm:$0xff]  ;;  %v292_v54 = vld [vmem:[#allocation8 + $0x70] sm:$0xff]  ;;  %v291_v57 = vld [vmem:[#allocation8 + $0x68] sm:$0xff] }
  0x45   :  { %407 = vmatpush3.msra.mxu0 %v87_v22  ;;  %472 = vmatpush3.msra.mxu1 %v196_v32  ;;  %v77_v56 = vld [vmem:[%s756_s2] sm:$0x3]  ;;  %v290_v59 = vld [vmem:[#allocation8 + $0x60] sm:$0xff]  ;;  %v289_v60 = vld [vmem:[#allocation8 + $0x58] sm:$0xff] }
  0x46   :  { %408 = vmatprep.subr.mxu0 %v102_v24  ;;  %473 = vmatprep.subr.mxu1 %v652_v0  ;;  %v206_v58 = vrot.slane %v77_v56, %v205_v55  ;;  %v288_v61 = vld [vmem:[#allocation8 + $0x50] sm:$0xff]  ;;  %v287_v62 = vld [vmem:[#allocation8 + $0x48] sm:$0xff]  ;;  %v286_v63 = vld [vmem:[#allocation8 + $0x40] sm:$0xff]  ;;  %v115_v8 = vrot.slane %v77_v56, %v114_v6 }
  0x47   :  { %409 = vmatpush3.msra.mxu0 %v86_v25  ;;  %474 = vmatpush3.msra.mxu1 %v195_v35  ;;  %v285_v1 = vld [vmem:[#allocation8 + $0x38] sm:$0xff]  ;;  %v284_v2 = vld [vmem:[#allocation8 + $0x30] sm:$0xff]  ;;  %v283_v3 = vld [vmem:[#allocation8 + $0x28] sm:$0xff] }
  0x48   :  { %410 = vmatprep.subr.mxu0 %v101_v27  ;;  %475 = vmatprep.subr.mxu1 %v652_v0  ;;  %v282_v4 = vld [vmem:[#allocation8 + $0x20] sm:$0xff]  ;;  %v281_v5 = vld [vmem:[#allocation8 + $0x18] sm:$0xff]  ;;  %v280_v13 = vld [vmem:[#allocation8 + $0x10] sm:$0xff] }
  0x49   :  { %411 = vmatpush3.msra.mxu0 %v85_v28  ;;  %476 = vmatpush3.msra.mxu1 %v194_v38  ;;  %v279_v14 = vld [vmem:[#allocation8 + $0x8] sm:$0xff]  ;;  %v278_v15 = vld [vmem:[#allocation8] sm:$0xff]  ;;  %v389_v20 = vld [vmem:[%s759_s5] ss:$0 sm:$0xff] }
  0x4a   :  { %412 = vmatprep.subr.mxu0 %v100_v30  ;;  %477 = vmatprep.subr.mxu1 %v652_v0 }
  0x4b   :  { %413 = vmatpush3.msra.mxu0 %v84_v31  ;;  %478 = vmatpush3.msra.mxu1 %v193_v41 }
  0x4c   :  { %414 = vmatprep.subr.mxu0 %v99_v33  ;;  %479 = vmatprep.subr.mxu1 %v652_v0 }
  0x4d   :  { %415 = vmatpush3.msra.mxu0 %v83_v34  ;;  %480 = vmatpush3.msra.mxu1 %v192_v44 }
  0x4e   :  { %416 = vmatprep.subr.mxu0 %v98_v36  ;;  %481 = vmatprep.subr.mxu1 %v652_v0 }
  0x4f   :  { %417 = vmatpush3.msra.mxu0 %v82_v37  ;;  %482 = vmatpush3.msra.mxu1 %v191_v46 }
  0x50   :  { %418 = vmatprep.subr.mxu0 %v97_v39  ;;  %483 = vmatprep.subr.mxu1 %v652_v0 }
  0x51   :  { %419 = vmatpush3.msra.mxu0 %v81_v40  ;;  %484 = vmatpush3.msra.mxu1 %v190_v47 }
  0x52   :  { %420 = vmatprep.subr.mxu0 %v96_v42  ;;  %485 = vmatprep.subr.mxu1 %v652_v0 }
  0x53   :  { %421 = vmatpush3.msra.mxu0 %v80_v43  ;;  %486 = vmatpush3.msra.mxu1 %v189_v49 }
  0x54   :  { %181 = vmatmul.mubr.f32.vlgmr.msra.gmra.mxu0 %v78_v45  ;;  %494 = vmatprep.subr.mxu0 %v652_v0 }
  0x55   :  { %487 = vmatprep.subr.mxu1 %v652_v0  ;;  %526 = vmatprep.mubr.msk.f32.mxu0 %vm653_vm0, %v652_v0 }
  0x56   :  { %488 = vmatpush3.msra.mxu1 %v188_v50  ;;  %495 = vmatpush3.msra.mxu0 %v293_v53 }
  0x57   :  { %489 = vmatprep.subr.mxu1 %v652_v0  ;;  %496 = vmatprep.subr.mxu0 %v652_v0 }
  0x58   :  { %490 = vmatpush3.msra.mxu1 %v187_v52  ;;  %497 = vmatpush3.msra.mxu0 %v292_v54 }
  0x59   :  { %498 = vmatprep.subr.mxu0 %v652_v0 }
  0x5a   :  { %499 = vmatpush3.msra.mxu0 %v291_v57 }
  0x5b   :  { %500 = vmatprep.subr.mxu0 %v652_v0 }
  0x5c   :  { %501 = vmatpush3.msra.mxu0 %v290_v59 }
  0x5d   :  { %502 = vmatprep.subr.mxu0 %v652_v0 }
  0x5e   :  { %503 = vmatpush3.msra.mxu0 %v289_v60 }
  0x5f   :  { %504 = vmatprep.subr.mxu0 %v652_v0 }
  0x60   :  { %505 = vmatpush3.msra.mxu0 %v288_v61 }
  0x61   :  { %506 = vmatprep.subr.mxu0 %v652_v0 }
  0x62   :  { %507 = vmatpush3.msra.mxu0 %v287_v62 }
  0x63   :  { %508 = vmatprep.subr.mxu0 %v652_v0 }
  0x64   :  { %509 = vmatpush3.msra.mxu0 %v286_v63 }
  0x65   :  { %510 = vmatprep.subr.mxu0 %v652_v0 }
  0x66   :  { %511 = vmatpush3.msra.mxu0 %v285_v1 }
  0x67   :  { %512 = vmatprep.subr.mxu0 %v652_v0 }
  0x68   :  { %513 = vmatpush3.msra.mxu0 %v284_v2 }
  0x69   :  { %514 = vmatprep.subr.mxu0 %v652_v0 }
  0x6a   :  { %515 = vmatpush3.msra.mxu0 %v283_v3 }
  0x6b   :  { %516 = vmatprep.subr.mxu0 %v652_v0 }
  0x6c   :  { %517 = vmatpush3.msra.mxu0 %v282_v4 }
  0x6d   :  { %518 = vmatprep.subr.mxu0 %v652_v0 }
  0x6e   :  { %519 = vmatpush3.msra.mxu0 %v281_v5 }
  0x6f   :  { %520 = vmatprep.subr.mxu0 %v652_v0 }
  0x70   :  { %521 = vmatpush3.msra.mxu0 %v280_v13 }
  0x71   :  { %522 = vmatprep.subr.mxu0 %v652_v0 }
  0x72   :  { %523 = vmatpush3.msra.mxu0 %v279_v14 }
  0x73   :  { %524 = vmatprep.subr.mxu0 %v652_v0 }
  0x74   :  { %525 = vmatpush3.msra.mxu0 %v278_v15 }
 0x114   :  { %v422_v7 = vpop.f32.mrf.mxu0 }
 0x116   :  { %v423_v9 = vpop.f32.mrf.mxu0 }
 0x117   :  { %v424_v10 = vadd.f32 %v423_v9, %v422_v7 }
 0x119   :  { %v183_v11 = vadd.f32 %v424_v10, %v115_v8 }
 0x11b   :  { %v186_v12 = vmax.f32 %v183_v11, 0.0 }
 0x11d   :  { %492 = vmatmul.mubr.f32.vlgmr.msra.gmra.mxu1 %v186_v12 }
 0x1dd   :  { %v273_v16 = vpop.f32.mrf.mxu1 }
 0x1de   :  { %v274_v17 = vadd.f32 %v273_v16, %v206_v58 }
 0x1df   :  { %v493_v18 = vpop.f32.mrf.mxu1 }
 0x1e0   :  { %v277_v19 = vmax.f32 %v274_v17, 0.0 }
 0x1e2   :  { %527 = vmatmul.mubr.f32.vlgmr.msra.gmra.mxu0 %v277_v19 }
 0x2a2   :  { %v367_v21 = vpop.f32.mrf.mxu0 }
 0x2a3   :  { %v368_v22 = vadd.f32 %v389_v20, %v367_v21 }
 0x2a4   :  { %v528_v23 = vpop.f32.mrf.mxu0 }
 0x2a5   :  { %371 = vst [vmem:[#allocation10] sm:$0xff] %v368_v22 }
 0x2a6   :  { %629 = shalt.err (!%p626_p10)
}
 0x2a7   :  { %381 = dma.vmem_to_hbm [thread:$0]  %s379_s19, 128, %s760_s6, [#allocation4]  }
 0x2a8   :  { %644 = dma.done.wait [#allocation4], 128  }
 0x2a9   :  { %645 = vsyncadd [#allocation4], 4294967168 }
 0x2aa   :  { %385 = vsyncpa [#allocation3], 1 }
 0x2ab   :  { %386 = vsyncpa [#allocation6], 1 }
 0x2ac   :  { %387 = vsyncpa [#allocation9], 1 }
 0x2ad   :  { %388 = vsyncpa [#allocation4], 1 }

</bundles_post_ra>
